<compile_context>
chip_gen: v6e
topology: v6e:2x2x1
jax: 0.10.0
libtpu: 0.0.40
codegen_flags: <defaults>
</compile_context>

<pallas_src>
import functools

import jax
import jax.numpy as jnp
from jax.experimental import pallas as pl
from jax.experimental.pallas import tpu as pltpu


def _round_up(x, m):
    return ((x + m - 1) // m) * m


def generator_kernel(x_ref, w_ref, b_ref, o_ref, m_ref, l_ref):
    j = pl.program_id(1)                  # vocab tile index
    n_vocab_tiles = pl.num_programs(1)
    tile_n = w_ref.shape[0]               # W block is (tile_n, d_model)

    @pl.when(j == 0)
    def _init():
        m_ref[...] = jnp.full_like(m_ref, -jnp.inf)
        l_ref[...] = jnp.zeros_like(l_ref)

    # bf16 x bf16 -> f32 on the MXU, weight kept in native (vocab, d_model) layout:
    # contract dim 1 of x with dim 1 of W  ==  x @ W.T.  Bias added in f32.
    logits = jax.lax.dot_general(
        x_ref[...], w_ref[...],
        dimension_numbers=(((1,), (1,)), ((), ())),
        preferred_element_type=jnp.float32,
    ) + b_ref[...]

    # Online softmax statistics (running max / running sum-exp), f32.
    m_prev = m_ref[...]
    m_new = jnp.maximum(m_prev, jnp.max(logits, axis=-1, keepdims=True))
    l_ref[...] = (l_ref[...] * jnp.exp(m_prev - m_new)
                  + jnp.sum(jnp.exp(logits - m_new), axis=-1, keepdims=True))
    m_ref[...] = m_new

    # Stash unnormalized logits into the VMEM-resident output block (acts as the
    # logits scratch; no recompute later).  Offset is 128-lane aligned.
    col = pl.multiple_of(j * tile_n, 128)
    o_ref[:, pl.ds(col, tile_n)] = logits.astype(o_ref.dtype)

    # Matmul-free fix-up on the last vocab tile: log_softmax = logits - (m + log l).
    @pl.when(j == n_vocab_tiles - 1)
    def _finalize():
        shift = m_ref[...] + jnp.log(l_ref[...])          # computed once per row tile
        o_ref[...] = (o_ref[...].astype(jnp.float32) - shift).astype(o_ref.dtype)


@functools.partial(jax.jit, static_argnames=("tile_m", "tile_n", "out_dtype"))
def generator_forward(x, W, b, *, tile_m=256, tile_n=1024, out_dtype=jnp.float32):
    """x: (B, S, d_model); W: (vocab, d_model) (nn.Linear layout); b: (vocab,).

    Pass W already cast to bf16 to avoid a per-call cast copy (cached weights).
    """
    B, S, d_model = x.shape
    vocab = W.shape[0]
    n_rows = B * S

    # Row-tile selection: f32/bf16 sublane alignment (8), bounded tail-padding waste,
    # and >= 2 row tiles when possible so the "parallel" axis splits across v7x's 2 TCs.
    tile_m = max(8, min(_round_up(tile_m, 8), _round_up(n_rows, 8)))
    while tile_m > 8 and (
            _round_up(n_rows, tile_m) - n_rows > tile_m // 2
            or (n_rows > 8 and _round_up(n_rows, tile_m) // tile_m < 2)):
        tile_m = max(8, _round_up(tile_m // 2, 8))
    rows_pad = _round_up(n_rows, tile_m)

    # Vocab tile: lane-dense multiple of 128.
    tile_n = max(128, min(_round_up(tile_n, 128), _round_up(vocab, 128)))
    vocab_pad = _round_up(vocab, tile_n)

    # bf16 matmul inputs; bias stays f32 and is added into the f32 logits.
    x2 = x.reshape(n_rows, d_model).astype(jnp.bfloat16)
    w = W.astype(jnp.bfloat16)               # no-op when caller caches bf16 weights
    b2 = b.astype(jnp.float32).reshape(1, vocab)

    if rows_pad != n_rows:
        x2 = jnp.pad(x2, ((0, rows_pad - n_rows), (0, 0)))
    if vocab_pad != vocab:
        w = jnp.pad(w, ((0, vocab_pad - vocab), (0, 0)))
        # Mask padded vocab columns out of the softmax with a very negative f32 bias.
        b2 = jnp.pad(b2, ((0, 0), (0, vocab_pad - vocab)), constant_values=-1e30)

    row_tiles = rows_pad // tile_m
    vocab_tiles = vocab_pad // tile_n
    out_bytes = jnp.dtype(out_dtype).itemsize

    # VMEM footprint (double-buffered tiles + resident output block + stats scratch);
    # capped at 56 MiB so defaults fit v7x's 64 MiB VMEM.  Shrink tiles if this caps.
    vmem_need = (2 * (tile_m * d_model * 2          # x tile (bf16)
                      + tile_n * d_model * 2        # W tile (bf16)
                      + tile_n * 4                  # bias tile (f32)
                      + tile_m * vocab_pad * out_bytes)  # resident output block
                 + 2 * tile_m * 128 * 4)            # m / l scratch (lane-padded)
    vmem_limit = int(min(max(int(vmem_need * 1.5), 32 * 2**20), 56 * 2**20))

    cost = pl.CostEstimate(
        flops=2 * rows_pad * d_model * vocab_pad,              # single matmul pass
        transcendentals=rows_pad * vocab_pad + rows_pad,       # exp + one log per row
        bytes_accessed=(rows_pad * d_model * 2                 # x (bf16)
                        + row_tiles * vocab_pad * d_model * 2  # W streamed once/row tile
                        + vocab_pad * 4                        # bias
                        + rows_pad * vocab_pad * out_bytes),   # output written once
    )

    out = pl.pallas_call(
        generator_kernel,
        out_shape=jax.ShapeDtypeStruct((rows_pad, vocab_pad), out_dtype),
        grid_spec=pltpu.PrefetchScalarGridSpec(
            num_scalar_prefetch=0,
            grid=(row_tiles, vocab_tiles),
            in_specs=[
                # x row-tile: resident across the vocab axis.
                pl.BlockSpec((tile_m, d_model), lambda i, j: (i, 0)),
                # weight vocab-tile in native (vocab, d_model) layout, streamed along j.
                pl.BlockSpec((tile_n, d_model), lambda i, j: (j, 0)),
                # bias vocab-tile.
                pl.BlockSpec((1, tile_n), lambda i, j: (0, j)),
            ],
            # Full-vocab output block per row tile, VMEM-resident across the vocab
            # axis (index constant in j): doubles as the logits scratch, written back
            # to HBM exactly once per row tile.
            out_specs=pl.BlockSpec((tile_m, vocab_pad), lambda i, j: (i, 0)),
            scratch_shapes=[
                pltpu.VMEM((tile_m, 1), jnp.float32),   # running max
                pltpu.VMEM((tile_m, 1), jnp.float32),   # running sum-exp
            ],
        ),
        compiler_params=pltpu.CompilerParams(
            dimension_semantics=("parallel", "arbitrary"),
            vmem_limit_bytes=vmem_limit,
        ),
        cost_estimate=cost,
    )(x2, w, b2)

    if rows_pad != n_rows or vocab_pad != vocab:
        out = out[:n_rows, :vocab]
    return out.reshape(B, S, vocab)


if __name__ == "__main__":
    # Small, module-consistent shapes.  tile_m=8 / tile_n=128 give a 2x2 grid so both
    # the megacore row split and the multi-tile online log-softmax path are exercised,
    # with no padding (no post-kernel slice copy).
    B, S, d_model, vocab = 2, 8, 32, 256

    key = jax.random.PRNGKey(0)
    kx, kw, kb = jax.random.split(key, 3)

    # nn.Linear(d_model, vocab): W (vocab, d_model), b (vocab,)
    W = jax.random.normal(kw, (vocab, d_model), dtype=jnp.float32) * 0.05
    b = jax.random.normal(kb, (vocab,), dtype=jnp.float32) * 0.01
    x = jax.random.normal(kx, (B, S, d_model), dtype=jnp.float32)

    # Cache the bf16 weight once (avoids a per-call cast copy inside the jitted wrapper).
    W_bf16 = W.astype(jnp.bfloat16)

    out = jax.block_until_ready(generator_forward(x, W_bf16, b, tile_m=8, tile_n=128))

    # Reference using the same bf16-matmul / f32-accumulate path.
    logits_ref = jnp.dot(x.reshape(-1, d_model).astype(jnp.bfloat16),
                         W_bf16.T,
                         preferred_element_type=jnp.float32) + b
    ref = jax.nn.log_softmax(logits_ref, axis=-1).reshape(B, S, vocab)

    assert out.shape == (B, S, vocab)
    assert jnp.allclose(out, ref, atol=2e-3, rtol=2e-3), float(jnp.max(jnp.abs(out - ref)))

    # Also sanity-check against pure-f32 PyTorch-equivalent math (looser tol for bf16).
    ref_f32 = jax.nn.log_softmax(x @ W.T + b, axis=-1)
    assert jnp.allclose(out, ref_f32, atol=5e-2, rtol=5e-2)

    print("KERNEL_OK")
</pallas_src>

<mosaic_0001>
module attributes {stable_mosaic.version = 11 : i64} {
  func.func @generator_kernel(%arg0: i32, %arg1: i32, %arg2: memref<8x32xbf16, #tpu.memory_space<vmem>>, %arg3: memref<128x32xbf16, #tpu.memory_space<vmem>>, %arg4: memref<1x128xf32, #tpu.memory_space<vmem>>, %arg5: memref<8x256xf32, #tpu.memory_space<vmem>>, %arg6: memref<8x1xf32, #tpu.memory_space<vmem>>, %arg7: memref<8x1xf32, #tpu.memory_space<vmem>>) attributes {dimension_semantics = [#tpu.dimension_semantics<parallel>, #tpu.dimension_semantics<arbitrary>], iteration_bounds = array<i64: 2, 2>, scalar_prefetch = 0 : i64, scratch_operands = 2 : i64, tpu.core_type = #tpu.core_type<tc>, window_params = [{transform_indices = @transform_0, window_bounds = array<i64: 8, 32>}, {transform_indices = @transform_1, window_bounds = array<i64: 128, 32>}, {transform_indices = @transform_2, window_bounds = array<i64: 1, 128>}, {transform_indices = @transform_3, window_bounds = array<i64: 8, 256>}]} {
    %c0_i32 = arith.constant 0 : i32
    %0 = arith.cmpi eq, %arg1, %c0_i32 : i32
    %1 = arith.extui %0 : i1 to i32
    %c0_i32_0 = arith.constant 0 : i32
    %2 = arith.cmpi ne, %1, %c0_i32_0 : i32
    scf.if %2 {
      %cst_18 = arith.constant 0xFF800000 : f32
      %32 = vector.broadcast %cst_18 : f32 to vector<8x1xf32>
      %c0_19 = arith.constant 0 : index
      %c0_20 = arith.constant 0 : index
      %33 = vector.load %arg6[%c0_19, %c0_20] : memref<8x1xf32, #tpu.memory_space<vmem>>, vector<8x1xf32>
      tpu.vector_store %arg6[%c0_19, %c0_20], %32 {strides = array<i32>} : memref<8x1xf32, #tpu.memory_space<vmem>>, vector<8x1xf32>,
      %cst_21 = arith.constant 0.000000e+00 : f32
      %34 = vector.broadcast %cst_21 : f32 to vector<8x1xf32>
      %c0_22 = arith.constant 0 : index
      %c0_23 = arith.constant 0 : index
      %35 = vector.load %arg7[%c0_22, %c0_23] : memref<8x1xf32, #tpu.memory_space<vmem>>, vector<8x1xf32>
      tpu.vector_store %arg7[%c0_22, %c0_23], %34 {strides = array<i32>} : memref<8x1xf32, #tpu.memory_space<vmem>>, vector<8x1xf32>,
    } else {
    }
    %c0 = arith.constant 0 : index
    %c0_1 = arith.constant 0 : index
    %3 = vector.load %arg2[%c0, %c0_1] : memref<8x32xbf16, #tpu.memory_space<vmem>>, vector<8x32xbf16>
    %c0_2 = arith.constant 0 : index
    %c0_3 = arith.constant 0 : index
    %4 = vector.load %arg3[%c0_2, %c0_3] : memref<128x32xbf16, #tpu.memory_space<vmem>>, vector<128x32xbf16>
    %cst = arith.constant dense<0.000000e+00> : vector<8x128xf32>
    %5 = tpu.matmul %3, %4, %cst {dimension_numbers = #tpu.dot_dimension_numbers<[1], [1], [0], [0], [0, 0, 1, 0], [], []>} : vector<8x32xbf16>, vector<128x32xbf16>, vector<8x128xf32> -> vector<8x128xf32>
    %c0_4 = arith.constant 0 : index
    %c0_5 = arith.constant 0 : index
    %6 = vector.load %arg4[%c0_4, %c0_5] : memref<1x128xf32, #tpu.memory_space<vmem>>, vector<1x128xf32>
    %7 = vector.broadcast %6 : vector<1x128xf32> to vector<8x128xf32>
    %8 = arith.addf %5, %7 : vector<8x128xf32>
    %c0_6 = arith.constant 0 : index
    %c0_7 = arith.constant 0 : index
    %9 = vector.load %arg6[%c0_6, %c0_7] : memref<8x1xf32, #tpu.memory_space<vmem>>, vector<8x1xf32>
    %cst_8 = arith.constant dense<0xFF800000> : vector<8xf32>
    %10 = vector.multi_reduction <maximumf>, %8, %cst_8 [1] : vector<8x128xf32> to vector<8xf32>
    %11 = vector.shape_cast %10 : vector<8xf32> to vector<8x1xf32>
    %12 = arith.maximumf %9, %11 : vector<8x1xf32>
    %c0_9 = arith.constant 0 : index
    %c0_10 = arith.constant 0 : index
    %13 = vector.load %arg7[%c0_9, %c0_10] : memref<8x1xf32, #tpu.memory_space<vmem>>, vector<8x1xf32>
    %14 = arith.subf %9, %12 : vector<8x1xf32>
    %15 = math.exp %14 : vector<8x1xf32>
    %16 = arith.mulf %13, %15 : vector<8x1xf32>
    %17 = vector.broadcast %12 : vector<8x1xf32> to vector<8x128xf32>
    %18 = arith.subf %8, %17 : vector<8x128xf32>
    %19 = math.exp %18 : vector<8x128xf32>
    %cst_11 = arith.constant dense<0.000000e+00> : vector<8xf32>
    %20 = vector.multi_reduction <add>, %19, %cst_11 [1] : vector<8x128xf32> to vector<8xf32>
    %21 = vector.shape_cast %20 : vector<8xf32> to vector<8x1xf32>
    %22 = arith.addf %16, %21 : vector<8x1xf32>
    %c0_12 = arith.constant 0 : index
    %c0_13 = arith.constant 0 : index
    %23 = vector.load %arg7[%c0_12, %c0_13] : memref<8x1xf32, #tpu.memory_space<vmem>>, vector<8x1xf32>
    tpu.vector_store %arg7[%c0_12, %c0_13], %22 {strides = array<i32>} : memref<8x1xf32, #tpu.memory_space<vmem>>, vector<8x1xf32>,
    %c0_14 = arith.constant 0 : index
    %c0_15 = arith.constant 0 : index
    %24 = vector.load %arg6[%c0_14, %c0_15] : memref<8x1xf32, #tpu.memory_space<vmem>>, vector<8x1xf32>
    tpu.vector_store %arg6[%c0_14, %c0_15], %12 {strides = array<i32>} : memref<8x1xf32, #tpu.memory_space<vmem>>, vector<8x1xf32>,
    %c128_i32 = arith.constant 128 : i32
    %25 = arith.muli %arg1, %c128_i32 : i32
    %26 = tpu.assume_multiple %25, 128 : i32
    %c0_16 = arith.constant 0 : index
    %27 = arith.index_cast %26 : i32 to index
    %28 = vector.load %arg5[%c0_16, %27] : memref<8x256xf32, #tpu.memory_space<vmem>>, vector<8x128xf32>
    tpu.vector_store %arg5[%c0_16, %27], %8 {strides = array<i32>} : memref<8x256xf32, #tpu.memory_space<vmem>>, vector<8x128xf32>,
    %c1_i32 = arith.constant 1 : i32
    %29 = arith.cmpi eq, %arg1, %c1_i32 : i32
    %30 = arith.extui %29 : i1 to i32
    %c0_i32_17 = arith.constant 0 : i32
    %31 = arith.cmpi ne, %30, %c0_i32_17 : i32
    scf.if %31 {
      %c0_18 = arith.constant 0 : index
      %c0_19 = arith.constant 0 : index
      %32 = vector.load %arg6[%c0_18, %c0_19] : memref<8x1xf32, #tpu.memory_space<vmem>>, vector<8x1xf32>
      %c0_20 = arith.constant 0 : index
      %c0_21 = arith.constant 0 : index
      %33 = vector.load %arg7[%c0_20, %c0_21] : memref<8x1xf32, #tpu.memory_space<vmem>>, vector<8x1xf32>
      %34 = math.log %33 : vector<8x1xf32>
      %35 = arith.addf %32, %34 : vector<8x1xf32>
      %c0_22 = arith.constant 0 : index
      %c0_23 = arith.constant 0 : index
      %36 = vector.load %arg5[%c0_22, %c0_23] : memref<8x256xf32, #tpu.memory_space<vmem>>, vector<8x256xf32>
      %37 = vector.broadcast %35 : vector<8x1xf32> to vector<8x256xf32>
      %38 = arith.subf %36, %37 : vector<8x256xf32>
      %c0_24 = arith.constant 0 : index
      %c0_25 = arith.constant 0 : index
      %39 = vector.load %arg5[%c0_24, %c0_25] : memref<8x256xf32, #tpu.memory_space<vmem>>, vector<8x256xf32>
      tpu.vector_store %arg5[%c0_24, %c0_25], %38 {strides = array<i32>} : memref<8x256xf32, #tpu.memory_space<vmem>>, vector<8x256xf32>,
    } else {
    }
    return
  }
  func.func @transform_0(%arg0: i32, %arg1: i32) -> (i32, i32) {
    %c0_i32 = arith.constant 0 : i32
    %c0_i32_0 = arith.constant 0 : i32
    return %arg0, %c0_i32 : i32, i32
  }
  func.func @transform_1(%arg0: i32, %arg1: i32) -> (i32, i32) {
    %c0_i32 = arith.constant 0 : i32
    %c0_i32_0 = arith.constant 0 : i32
    return %arg1, %c0_i32 : i32, i32
  }
  func.func @transform_2(%arg0: i32, %arg1: i32) -> (i32, i32) {
    %c0_i32 = arith.constant 0 : i32
    %c0_i32_0 = arith.constant 0 : i32
    return %c0_i32, %arg1 : i32, i32
  }
  func.func @transform_3(%arg0: i32, %arg1: i32) -> (i32, i32) {
    %c0_i32 = arith.constant 0 : i32
    %c0_i32_0 = arith.constant 0 : i32
    return %arg0, %c0_i32 : i32, i32
  }
}

</mosaic_0001>

<bundles_post_ra>
// kernel: generator_forward.1
= control target key start
LH: loop header
LB: loop body
LE: loop exit
PB: predicated region body
PF: predicated region fallthrough
CT: control target
= control target key end

     0   :  { %8 = vsyncpa [#allocation5], 0  ;;  %s958_s0 = inlined_call_operand.vmem [shape: bf16[16,32], index: 0, kind: input, shape index: {}]   ;;  %s959_s1 = inlined_call_operand.vmem [shape: bf16[256,32], index: 1, kind: input, shape index: {}]   ;;  %s960_s2 = inlined_call_operand.vmem [shape: f32[1,256], index: 2, kind: input, shape index: {}]   ;;  %s961_s3 = inlined_call_operand.hbm [shape: f32[16,256], index: 3, kind: output, shape index: {}]  }
   0x1   :  { %10 = vsyncpa [#allocation5 + $0x1], 0  ;;  %s783_s12 = smov 0   ;;  %s785_s13 = smov 0  }
   0x2   :  { %s787_s14 = smov 0   ;;  %s789_s15 = smov 0  }
   0x3   :  { %s791_s16 = smov 0   ;;  %s793_s17 = smov 0  }
   0x4   :  { %s795_s18 = smov 0   ;;  %s797_s19 = smov 0  }
   0x5 LB: > { %s511_s20 = sadd.s32 4294967295, %s754_s19   ;;  %s512_s21 = sadd.s32 4294967294, %s754_s19   ;;  %s754_s19 = sphi %s797_s19, %s16_s19   ;;  %s750_s18 = sphi %s795_s18, %s975_s18   ;;  %s746_s17 = sphi %s793_s17, %s974_s17   ;;  %s742_s16 = sphi %s791_s16, %s973_s16   ;;  %s738_s15 = sphi %s789_s15, %s972_s15   ;;  %s734_s14 = sphi %s787_s14, %s971_s14   ;;  %s730_s13 = sphi %s785_s13, %s970_s13   ;;  %s726_s12 = sphi %s783_s12, %s969_s12  }
   0x6   : > { %s25_s22 = sadd.s32 1, %s746_s17  ;;  %s28_s23 = sadd.s32 1, %s750_s18 }
   0x7   : > { %p26_p0 = scmp.ge.s32.totalorder %s25_s22, 2  ;;  %p123_p1 = scmp.ne.s32.totalorder %s734_s14, %s730_s13 }
   0x8   : > { %p124_p2 = scmp.eq.s32.totalorder %s511_s20, 3  ;;  %p129_p4 = scmp.ne.s32.totalorder %s730_s13, %s726_s12 }
   0x9   : > { %s977_s22 = smov (%p26_p0, %s25_s22), 0  ;;  %s979_s23 = smov (!%p26_p0, %s28_s23), %s750_s18 }
   0xa   : > { %p832_p3 = por %p124_p2, %p123_p1  ;;  %p30_p5 = scmp.ge.s32.totalorder %s979_s23, 2 }
   0xb   : > { %p130_p6 = scmp.eq.s32.totalorder %s512_s21, 3  ;;  %p515_p7 = scmp.ge.s32.totalorder %s754_s19, 1 }
   0xc   : > { %p170_p8 = scmp.lt.s32.totalorder %s754_s19, 5  ;;  %s981_s23 = smov (%p30_p5, %s979_s23), 0 }
   0xd   : > { %965 = sst [smem:[#allocation7_spill]] %s981_s23  ;;  %p842_p9 = por %p130_p6, %p129_p4 }
   0xe   : > { %p171_p10 = pnand %p515_p7, %p170_p8  ;;  %s110_s26 = ssub.s32 %s750_s18, %s981_s23 }
   0xf   : > { %s113_s27 = sadd.s32 1, %s734_s14  ;;  %p111_p11 = scmp.eq.s32.totalorder %s110_s26, 0 }
  0x10   : > { %174 = sbr.rel (%p171_p10) target bundleno = 892 (0x37c), region = 32  ;;  %s962_s29 = sand.u32 (!%p171_p10), 1, %s730_s13  }
  0x11   : > { %s850_s28 = scalar_select %p111_p11, %s734_s14, %s113_s27  }
  0x12   : > { %p201_p12 = scmp.lt.s32.totalorder (!%p171_p10), %s742_s16, 1  ;;  %s516_s30 = sshll.u32 (!%p171_p10), %s962_s29, 4 }
  0x13   : > { %s518_s4 = sshll.u32 (!%p171_p10), %s738_s15, 4  ;;  %p211_p0 = scmp.lt.s32.totalorder (!%p171_p10), %s738_s15, 1 }
  0x14   : > { %p206_p13 = scmp.lt.s32.totalorder (!%p171_p10), %s518_s4, 31  ;;  %p520_p1 = scmp.ne.s32.totalorder (!%p171_p10), %s738_s15, 0 }
  0x15   : > { %s202_s5 = scalar_select %p201_p12, %s742_s16, 1 }
  0x16   : > { %s983_s4 = smov (!%p206_p13, %s518_s4), 31 }
  0x17   : > { %s517_s6 = sshll.u32 %s202_s5, 2  ;;  %s519_s10 = sshll.u32 %s983_s4, 2 }
  0x18   : > { %s862_s9 = scalar_lea.vmem %s958_s0, %s517_s6  ;;  %s867_s21 = scalar_lea.vmem %s959_s1, %s519_s10 }
  0x19   : > { %s870_s26 = scalar_select %p211_p0, %s738_s15, 1 }
  0x1a   : > { %s876_s5 = scalar_lea.vmem [#allocation4], %s516_s30  ;;  %218 = sbr.rel (%p520_p1) target bundleno = 33 (0x21), region = 36 }
  0x1b   : > { %s213_s23 = scalar_lea.vmem %s960_s2, %s870_s26 }
  0x1f   : > { %vm219_vm0 = vcmask 7168   ;;  %v756_v0 = vmov -inf   ;;  %v757_v1 = vmov 0.0  }
  0x20   : > { %220 = vst.msk [vmem:[#allocation2] sm:$0xff] %vm219_vm0, %v756_v0  ;;  %221 = vst.msk [vmem:[#allocation3] sm:$0xff] %vm219_vm0, %v757_v1 }
  0x21 PF: > { %v647_v2 = vld [vmem:[%s867_s21 + $0x38] sm:$0xff]   ;;  %v758_v3 = vmov 0.0   ;;  %vm286_vm1 = vcmask 261120   ;;  %v648_v5 = vld [vmem:[%s867_s21 + $0x30] sm:$0xff]   ;;  %vm759_vm2 = vmmov 0   ;;  %v649_v7 = vld [vmem:[%s867_s21 + $0x28] sm:$0xff]  }
  0x22   : > { %549 = vmatprep.subr.bf16.mxu0 %v758_v3  ;;  %v312_v4 = vsel %vm286_vm1, %v647_v2, 0  ;;  %v309_v6 = vsel %vm286_vm1, %v648_v5, 0  ;;  %565 = vmatprep.mubr.msk.bf16.mxu0 %vm759_vm2, %v758_v3  ;;  %v306_v8 = vsel %vm286_vm1, %v649_v7, 0  ;;  %v650_v9 = vld [vmem:[%s867_s21 + $0x20] sm:$0xff]   ;;  %v651_v11 = vld [vmem:[%s867_s21 + $0x18] sm:$0xff]   ;;  %v652_v13 = vld [vmem:[%s867_s21 + $0x10] sm:$0xff]  }
  0x23   : > { %550 = vmatpush3.bf16.xpose.msra.mxu0 %v312_v4  ;;  %v303_v10 = vsel %vm286_vm1, %v650_v9, 0  ;;  %v300_v12 = vsel %vm286_vm1, %v651_v11, 0  ;;  %v297_v14 = vsel %vm286_vm1, %v652_v13, 0  ;;  %v653_v15 = vld [vmem:[%s867_s21 + $0x8] sm:$0xff]   ;;  %v654_v17 = vld [vmem:[%s867_s21] sm:$0xff]   ;;  %s531_s29 = sshll.u32 %s738_s15, 7 }
  0x24   : > { %551 = vmatprep.subr.bf16.mxu0 %v758_v3  ;;  %v294_v16 = vsel %vm286_vm1, %v653_v15, 0  ;;  %v291_v18 = vsel %vm286_vm1, %v654_v17, 0  ;;  %v222_v19 = vld [vmem:[%s862_s9] sm:$0xf]  ;;  %s378_s30 = sshra.s32 %s531_s29, 7  ;;  %v760_v26 = vmov 0  }
  0x25   : > { %s532_s4 = sshll.u32 %s378_s30, 3  ;;  %v521_v20 = vld [vmem:[%s213_s23] ss:$0 sm:$0xff]  ;;  %646 = vset.pattern.permute.xlu0 %v760_v26  ;;  %vm374_vm3 = vcmask 7168   ;;  %p533_p2 = scmp.ne.s32.totalorder %s738_s15, 1 }
  0x26   : > { %s381_s8 = scalar_lea.vmem %s876_s5, %s532_s4 [#allocation4] }
  0x27   : > { %v354_v27 = vld [vmem:[#allocation2] sm:$0xff]  ;;  %v358_v37 = vld [vmem:[#allocation3] sm:$0xff] }
  0x2b   : > { %552 = vmatpush3.bf16.xpose.msra.mxu0 %v309_v6 }
  0x2c   : > { %553 = vmatprep.subr.bf16.mxu0 %v758_v3 }
  0x33   : > { %554 = vmatpush3.bf16.xpose.msra.mxu0 %v306_v8 }
  0x34   : > { %555 = vmatprep.subr.bf16.mxu0 %v758_v3 }
  0x3b   : > { %556 = vmatpush3.bf16.xpose.msra.mxu0 %v303_v10 }
  0x3c   : > { %557 = vmatprep.subr.bf16.mxu0 %v758_v3 }
  0x43   : > { %558 = vmatpush3.bf16.xpose.msra.mxu0 %v300_v12 }
  0x44   : > { %559 = vmatprep.subr.bf16.mxu0 %v758_v3 }
  0x4b   : > { %560 = vmatpush3.bf16.xpose.msra.mxu0 %v297_v14 }
  0x4c   : > { %561 = vmatprep.subr.bf16.mxu0 %v758_v3 }
  0x53   : > { %562 = vmatpush3.bf16.xpose.msra.mxu0 %v294_v16 }
  0x54   : > { %563 = vmatprep.subr.bf16.mxu0 %v758_v3 }
  0x5b   : > { %564 = vmatpush3.bf16.xpose.msra.mxu0 %v291_v18 }
  0x62   : > { %566 = vmatmul.mubr.msk.bf16.vlgmr.msra.gmra.mxu0 %vm286_vm1, %v222_v19 }
 0x122   : > { %v348_v21 = vpop.f32.mrf.mxu0 }
 0x123   : > { %v349_v22 = vadd.f32 %v521_v20, %v348_v21 }
 0x124   : > { %v567_v23 = vpop.f32.mrf.mxu0 }
 0x125   : > { %382 = vst [vmem:[%s381_s8] sm:$0xff] %v349_v22  ;;  %355 = vmax.xlane.f32.xlu0 %v349_v22 }
 0x126   : > { %v351_v24 = vpop.f32.mrf.mxu0 }
 0x128   : > { %v568_v25 = vpop.f32.mrf.mxu0 }
 0x1ae   : > { %v356_v28 = vpop.xlane.xlu0 %355 }
 0x1af   : > { %v357_v29 = vmax.f32 %v354_v27, %v356_v28 }
 0x1b1   : > { %v359_v30 = vsub.f32 %v354_v27, %v357_v29  ;;  %376 = vst.msk [vmem:[#allocation2] sm:$0xff] %vm374_vm3, %v357_v29  ;;  %365 = vperm.xlu0 %646, %v357_v29  }
 0x1b3   : > { %v360_v35 = vmul.f32 1.442695, %v359_v30 }
 0x22c   : > { %v366_v31 = vpop.permute.xlu0 %365 }
 0x22d   : > { %v368_v32 = vsub.f32 %v349_v22, %v366_v31 }
 0x22f   : > { %v369_v33 = vmul.f32 1.442695, %v368_v32 }
 0x231   : > { %655 = vpow2.f32 %v369_v33 }
 0x232   : > { %657 = vpow2.f32 %v360_v35 }
 0x23e   : > { %v656_v34 = vpop.eup %655 }
 0x23f   : > { %371 = vadd.xlane.f32.xlu1 %v656_v34  ;;  %v658_v36 = vpop.eup %657 }
 0x240   : > { %v362_v38 = vmul.f32 %v658_v36, %v358_v37 }
 0x2c7   : > { %386 = sbr.rel (%p533_p2) target bundleno = 868 (0x364), region = 40 }
 0x2c8   : > { %v372_v39 = vpop.xlane.xlu1 %371 }
 0x2c9   : > { %v373_v40 = vadd.f32 %v372_v39, %v362_v38 }
 0x2cb   : > { %375 = vst.msk [vmem:[#allocation3] sm:$0xff] %vm374_vm3, %v373_v40 }
 0x2cc   : > { %v761_v42 = vmov 0   ;;  %v387_v44 = vld [vmem:[#allocation2] sm:$0xff]  ;;  %v393_v48 = vld [vmem:[%s876_s5 + $0x8] sm:$0xff] }
 0x2cd   : > { %659 = vset.pattern.permute.xlu0 %v761_v42  ;;  %v392_v47 = vld [vmem:[%s876_s5] sm:$0xff] }
 0x2d2   : > { %v388_v41 = vld [vmem:[#allocation3] sm:$0xff] }
 0x2d3   : > { %660 = vlog2.f32 %v388_v41 }
 0x2e0   : > { %v661_v43 = vpop.eup %660 }
 0x2e1   : > { %v390_v45 = vmul.f32 0.6931472, %v661_v43 }
 0x2e3   : > { %v391_v46 = vadd.f32 %v390_v45, %v387_v44 }
 0x2e5   : > { %396 = vperm.xlu0 %659, %v391_v46  }
 0x360   : > { %v397_v49 = vpop.permute.xlu0 %396 }
 0x361   : > { %v399_v50 = vsub.f32 %v392_v47, %v397_v49  ;;  %v400_v51 = vsub.f32 %v393_v48, %v397_v49 }
 0x363   : > { %401 = vst [vmem:[%s876_s5] sm:$0xff] %v399_v50  ;;  %402 = vst [vmem:[%s876_s5 + $0x8] sm:$0xff] %v400_v51 }
 0x364 PF: > { %s539_s15 = sshll.u32 %s742_s16, 8  ;;  %s418_s11 = sshll.u32 %s876_s5, 4  ;;  %s419_s11 = int_to_ptr.vmem [resolvable:$true] %s418_s11 }
 0x365   : > { %s416_s10 = scalar_lea.hbm %s961_s3, %s539_s15  ;;  %s967_s20 = sand.u32 1, %s730_s13  }
 0x366   : > { %s404_s21 = scalar_lea.sflag [#allocation5], %s967_s20  ;;  %s662_s26 = scalar_lea.vmem %s419_s11, 256 }
 0x367   : > { %p663_p4 = scmp.ne.s32.totalorder %s419_s11, %s662_s26  ;;  %s762_s27 = smov [#allocation4]  }
 0x368   : > { %s666_s29 = sshll.u32 %s762_s27, 4  ;;  %s667_s29 = int_to_ptr.vmem [resolvable:$false] %s666_s29 }
 0x369   : > { %p664_p5 = pnand %p663_p4, %p832_p3  ;;  %s668_s30 = scalar_lea.vmem %s667_s29, 512 }
 0x36a   : > { %p669_p7 = scmp.lt.s32.totalorder %s419_s11, %s667_s29  ;;  %p670_p8 = scmp.lt.s32.totalorder %s668_s30, %s662_s26 }
 0x36b   : > { %p665_p6 = pneg %p664_p5 }
 0x36c   : > { %p671_p10 = por %p670_p8, %p669_p7 }
 0x36e   : > { %p672_p11 = pnand %p671_p10, %p665_p6 }
 0x370   : > { %675 = shalt.err (!%p672_p11)
}
 0x371   : > { %s676_s16 = scalar_lea.hbm %s416_s10, 256  ;;  %s680_s6 = scalar_lea.hbm %s961_s3, 512 }
 0x372   : > { %p677_p12 = scmp.ne.s32.totalorder %s416_s10, %s676_s16  ;;  %p681_p1 = scmp.lt.s32.totalorder %s416_s10, %s961_s3 }
 0x373   : > { %p682_p2 = scmp.lt.s32.totalorder %s680_s6, %s676_s16 }
 0x374   : > { %p678_p13 = pnand %p677_p12, %p832_p3 }
 0x375   : > { %p683_p4 = por %p682_p2, %p681_p1 }
 0x376   : > { %p679_p0 = pneg %p678_p13 }
 0x378   : > { %p684_p5 = pnand %p683_p4, %p679_p0 }
 0x37a   : > { %687 = shalt.err (!%p684_p5)
}
 0x37b   : > { %569 = dma.vmem_to_hbm [thread:$0]  (%p832_p3), %s419_s11, 256, %s416_s10, %s404_s21  }
 0x37c PF: > { %p575_p6 = scmp.ge.s32.totalorder %s754_s19, 2  ;;  %s430_s15 = sand.u32 1, %s726_s12  }
 0x37d   : > { %s431_s23 = scalar_lea.sflag [#allocation5], %s430_s15 }
 0x37e   : > { %p572_p7 = pnand %p575_p6, %p842_p9 }
 0x380   : > { %p573_p8 = pneg %p572_p7 }
 0x382   : > { %721 = dma.done.wait (%p573_p8), %s431_s23, 256  }
 0x383   : > { %723 = vsyncadd (%p573_p8), %s431_s23, 4294967040  ;;  %s16_s19 = sadd.s32 1, %s754_s19   ;;  %s968_s24 = sld [smem:[#allocation7_spill]] }
 0x384   : > { %p13_p10 = scmp.ge.s32.totalorder %s16_s19, 6   ;;  %s969_s12 = smov %s730_s13 }
 0x385   : > { %s970_s13 = smov %s734_s14  ;;  %s971_s14 = smov %s850_s28 }
 0x386   : > { %s972_s15 = smov %s746_s17  ;;  %s973_s16 = smov %s750_s18 }
 0x387   : > { %s974_s17 = smov %s977_s22  ;;  %15 = sbr.rel (!%p13_p10) target bundleno = 5 (0x5), region = 82 }
 0x389   : > { %s975_s18 = smov %s968_s24 }
 0x38c   :  { %436 = vsyncpa [#allocation5], 1 }
 0x38d   :  { %438 = vsyncpa [#allocation5 + $0x1], 1 }

</bundles_post_ra>
